<compile_context>
chip_gen: v5e
topology: v5e:2x2
jax: 0.10.0
libtpu: 0.0.40
codegen_flags: <defaults>
</compile_context>

<pallas_src>
import jax
import jax.numpy as jnp
import numpy as np
from jax.experimental import pallas as pl
from jax.experimental.pallas import tpu as pltpu

# ---- small synthetic sizes (input_dim >= common_dim, as the torch code assumes) ----
B = 8
INPUT_DIM = 256
COMMON_DIM = 128
HIDDEN_DIM = 64
OUTPUT_DIM = 32
ALIGN_KEYS = (1, 2, 3, 4)
N_KEYS = len(ALIGN_KEYS)

# lane-padded widths used inside the kernel (128-lane dense matmuls / stores)
HIDDEN_PAD = 128
OUTPUT_PAD = 128

EPS = 1e-5  # torch.nn.LayerNorm default


def _layernorm_ref(x, gamma, beta):
    # two-pass reference LayerNorm (mirrors torch)
    mean = jnp.mean(x, axis=-1, keepdims=True)
    var = jnp.mean((x - mean) ** 2, axis=-1, keepdims=True)  # biased var
    inv = jax.lax.rsqrt(var + EPS)
    return (x - mean) * inv * gamma + beta


def _layernorm_1pass(x, gamma, beta, n):
    """Single-pass LayerNorm over the last axis with true feature count `n`.

    Padded lanes of `x` (if any) must be exactly zero so they contribute
    nothing to sum / sum-of-squares; stats are divided by `n`, not x.shape[-1].
    """
    s = jnp.sum(x, axis=-1, keepdims=True)
    ss = jnp.sum(x * x, axis=-1, keepdims=True)
    inv_n = 1.0 / float(n)
    mean = s * inv_n
    var = ss * inv_n - mean * mean
    inv = jax.lax.rsqrt(var + EPS)
    return (x - mean) * inv * gamma + beta


def encoder_kernel(k_ref, x_ref,
                   wa_ref, ba_ref,
                   g1_ref, bt1_ref,
                   w1_ref, b1_ref,
                   w2_ref, b2_ref,
                   g2_ref, bt2_ref,
                   o_ref):
    kvals = k_ref[...]                     # [B, 1] int32 (control data)

    # ---- hoisted one-hot key masks (computed once, before any MXU work) ----
    masks = [(kvals == key).astype(jnp.float32) for key in ALIGN_KEYS]  # each [B, 1]

    x = x_ref[...]                         # [B, INPUT_DIM] f32

    # ---- fused alignment: one lane-dense matmul over all 4 heads ----
    # wa_ref: [INPUT_DIM, N_KEYS*COMMON_DIM], ba_ref: [1, N_KEYS*COMMON_DIM]
    y_wide = jnp.dot(x, wa_ref[...], preferred_element_type=jnp.float32)
    y_wide = y_wide + ba_ref[...]          # [B, N_KEYS*COMMON_DIM]

    # Row-select the matching 128-lane slice per key (mutually exclusive masks;
    # rows with unknown keys stay zero, matching the reference semantics).
    # Static, 128-aligned lane slices -> no cross-tile relayout.
    aligned = jnp.zeros((y_wide.shape[0], COMMON_DIM), jnp.float32)
    for idx in range(N_KEYS):
        sl = y_wide[:, idx * COMMON_DIM:(idx + 1) * COMMON_DIM]
        aligned = aligned + masks[idx] * sl

    # ---- net: LayerNorm -> Linear -> ReLU -> Linear -> LayerNorm ----
    h = _layernorm_1pass(aligned, g1_ref[...], bt1_ref[...], COMMON_DIM)
    h = jnp.dot(h, w1_ref[...], preferred_element_type=jnp.float32) + b1_ref[...]
    h = jnp.maximum(h, 0.0)                # padded hidden lanes stay exactly 0
    h = jnp.dot(h, w2_ref[...], preferred_element_type=jnp.float32) + b2_ref[...]
    # padded output lanes are exactly 0, so stats over 128 lanes with divisor
    # OUTPUT_DIM are exact; padded lanes of the result are discarded by caller.
    o_ref[...] = _layernorm_1pass(h, g2_ref[...], bt2_ref[...], OUTPUT_DIM)


def init_params(key):
    keys = jax.random.split(key, 8)
    s_in = 1.0 / np.sqrt(INPUT_DIM)
    s_c = 1.0 / np.sqrt(COMMON_DIM)
    s_h = 1.0 / np.sqrt(HIDDEN_DIM)
    return dict(
        wa=jax.random.normal(keys[0], (N_KEYS, INPUT_DIM, COMMON_DIM),
                             jnp.float32) * s_in,
        ba=jax.random.normal(keys[1], (N_KEYS, COMMON_DIM), jnp.float32) * s_in,
        g1=jnp.ones((1, COMMON_DIM), jnp.float32),
        bt1=jnp.zeros((1, COMMON_DIM), jnp.float32),
        w1=jax.random.normal(keys[2], (COMMON_DIM, HIDDEN_DIM), jnp.float32) * s_c,
        b1=jax.random.normal(keys[3], (1, HIDDEN_DIM), jnp.float32) * s_c,
        w2=jax.random.normal(keys[4], (HIDDEN_DIM, OUTPUT_DIM), jnp.float32) * s_h,
        b2=jax.random.normal(keys[5], (1, OUTPUT_DIM), jnp.float32) * s_h,
        g2=jnp.ones((1, OUTPUT_DIM), jnp.float32),
        bt2=jnp.zeros((1, OUTPUT_DIM), jnp.float32),
    )


def pack_params(params):
    """One-time repack of parameters into kernel-friendly, lane-dense layouts."""
    # [N_KEYS, IN, C] -> [IN, N_KEYS*C]  (keys along the lane/output axis)
    wa_wide = jnp.transpose(params["wa"], (1, 0, 2)).reshape(
        INPUT_DIM, N_KEYS * COMMON_DIM)
    ba_wide = params["ba"].reshape(1, N_KEYS * COMMON_DIM)
    # zero-pad the narrow layers to 128 lanes (exact: padding adds zeros only)
    w1 = jnp.zeros((COMMON_DIM, HIDDEN_PAD), jnp.float32
                   ).at[:, :HIDDEN_DIM].set(params["w1"])
    b1 = jnp.zeros((1, HIDDEN_PAD), jnp.float32
                   ).at[:, :HIDDEN_DIM].set(params["b1"])
    w2 = jnp.zeros((HIDDEN_PAD, OUTPUT_PAD), jnp.float32
                   ).at[:HIDDEN_DIM, :OUTPUT_DIM].set(params["w2"])
    b2 = jnp.zeros((1, OUTPUT_PAD), jnp.float32
                   ).at[:, :OUTPUT_DIM].set(params["b2"])
    g2 = jnp.zeros((1, OUTPUT_PAD), jnp.float32
                   ).at[:, :OUTPUT_DIM].set(params["g2"])
    bt2 = jnp.zeros((1, OUTPUT_PAD), jnp.float32
                    ).at[:, :OUTPUT_DIM].set(params["bt2"])
    return dict(wa=wa_wide, ba=ba_wide,
                g1=params["g1"], bt1=params["bt1"],
                w1=w1, b1=b1, w2=w2, b2=b2, g2=g2, bt2=bt2)


@jax.jit
def encoder_forward(packed, x, k):
    k2 = k.astype(jnp.int32).reshape(-1, 1)            # [B, 1]
    args = (k2, x,
            packed["wa"], packed["ba"],
            packed["g1"], packed["bt1"],
            packed["w1"], packed["b1"],
            packed["w2"], packed["b2"],
            packed["g2"], packed["bt2"])
    vmem = pl.BlockSpec(memory_space=pltpu.MemorySpace.VMEM)
    out_pad = pl.pallas_call(
        encoder_kernel,
        out_shape=jax.ShapeDtypeStruct((B, OUTPUT_PAD), jnp.float32),
        in_specs=[vmem] * len(args),
        out_specs=vmem,
    )(*args)
    return out_pad[:, :OUTPUT_DIM]


def encoder_forward_ref(params, x, k):
    # Pure-JAX reference mirroring the torch module (unpacked params).
    kf = k.astype(jnp.int32)
    aligned = jnp.zeros((x.shape[0], COMMON_DIM), jnp.float32)
    for idx, key in enumerate(ALIGN_KEYS):
        y = x @ params["wa"][idx] + params["ba"][idx]
        aligned = jnp.where((kf == key)[:, None], y, aligned)
    h = _layernorm_ref(aligned, params["g1"], params["bt1"])
    h = jnp.maximum(h @ params["w1"] + params["b1"], 0.0)
    h = h @ params["w2"] + params["b2"]
    return _layernorm_ref(h, params["g2"], params["bt2"])


if __name__ == "__main__":
    root = jax.random.PRNGKey(0)
    k_params, k_x, k_k = jax.random.split(root, 3)

    params = init_params(k_params)
    packed = pack_params(params)

    x = jax.random.normal(k_x, (B, INPUT_DIM), jnp.float32)
    # per-sample alignment keys drawn from {1,2,3,4}
    k = jax.random.randint(k_k, (B,), 1, N_KEYS + 1, jnp.int32)

    out = jax.block_until_ready(encoder_forward(packed, x, k))

    ref = encoder_forward_ref(params, x, k)
    np.testing.assert_allclose(np.asarray(out), np.asarray(ref),
                               rtol=1e-4, atol=1e-4)

    # also exercise the k=None path (torch: k = ones(len(x)))
    k_ones = jnp.ones((B,), jnp.int32)
    out_none = jax.block_until_ready(encoder_forward(packed, x, k_ones))
    ref_none = encoder_forward_ref(params, x, k_ones)
    np.testing.assert_allclose(np.asarray(out_none), np.asarray(ref_none),
                               rtol=1e-4, atol=1e-4)

    print("KERNEL_OK")
</pallas_src>

<mosaic_0001>
module attributes {stable_mosaic.version = 11 : i64} {
  func.func @encoder_kernel(%arg0: memref<8x1xi32, #tpu.memory_space<vmem>>, %arg1: memref<8x256xf32, #tpu.memory_space<vmem>>, %arg2: memref<256x512xf32, #tpu.memory_space<vmem>>, %arg3: memref<1x512xf32, #tpu.memory_space<vmem>>, %arg4: memref<1x128xf32, #tpu.memory_space<vmem>>, %arg5: memref<1x128xf32, #tpu.memory_space<vmem>>, %arg6: memref<128x128xf32, #tpu.memory_space<vmem>>, %arg7: memref<1x128xf32, #tpu.memory_space<vmem>>, %arg8: memref<128x128xf32, #tpu.memory_space<vmem>>, %arg9: memref<1x128xf32, #tpu.memory_space<vmem>>, %arg10: memref<1x128xf32, #tpu.memory_space<vmem>>, %arg11: memref<1x128xf32, #tpu.memory_space<vmem>>, %arg12: memref<8x128xf32, #tpu.memory_space<vmem>>) attributes {dimension_semantics = [], scalar_prefetch = 0 : i64, scratch_operands = 0 : i64, tpu.core_type = #tpu.core_type<tc>} {
    %c0 = arith.constant 0 : index
    %c0_0 = arith.constant 0 : index
    %0 = vector.load %arg0[%c0, %c0_0] : memref<8x1xi32, #tpu.memory_space<vmem>>, vector<8x1xi32>
    %c1_i32 = arith.constant 1 : i32
    %1 = vector.broadcast %c1_i32 : i32 to vector<8x1xi32>
    %2 = arith.cmpi eq, %0, %1 : vector<8x1xi32>
    %3 = arith.extui %2 : vector<8x1xi1> to vector<8x1xi32>
    %4 = arith.sitofp %3 : vector<8x1xi32> to vector<8x1xf32>
    %c2_i32 = arith.constant 2 : i32
    %5 = vector.broadcast %c2_i32 : i32 to vector<8x1xi32>
    %6 = arith.cmpi eq, %0, %5 : vector<8x1xi32>
    %7 = arith.extui %6 : vector<8x1xi1> to vector<8x1xi32>
    %8 = arith.sitofp %7 : vector<8x1xi32> to vector<8x1xf32>
    %c3_i32 = arith.constant 3 : i32
    %9 = vector.broadcast %c3_i32 : i32 to vector<8x1xi32>
    %10 = arith.cmpi eq, %0, %9 : vector<8x1xi32>
    %11 = arith.extui %10 : vector<8x1xi1> to vector<8x1xi32>
    %12 = arith.sitofp %11 : vector<8x1xi32> to vector<8x1xf32>
    %c4_i32 = arith.constant 4 : i32
    %13 = vector.broadcast %c4_i32 : i32 to vector<8x1xi32>
    %14 = arith.cmpi eq, %0, %13 : vector<8x1xi32>
    %15 = arith.extui %14 : vector<8x1xi1> to vector<8x1xi32>
    %16 = arith.sitofp %15 : vector<8x1xi32> to vector<8x1xf32>
    %c0_1 = arith.constant 0 : index
    %c0_2 = arith.constant 0 : index
    %17 = vector.load %arg1[%c0_1, %c0_2] : memref<8x256xf32, #tpu.memory_space<vmem>>, vector<8x256xf32>
    %c0_3 = arith.constant 0 : index
    %c0_4 = arith.constant 0 : index
    %18 = vector.load %arg2[%c0_3, %c0_4] : memref<256x512xf32, #tpu.memory_space<vmem>>, vector<256x512xf32>
    %cst = arith.constant dense<0.000000e+00> : vector<8x512xf32>
    %19 = tpu.matmul %17, %18, %cst {dimension_numbers = #tpu.dot_dimension_numbers<[1], [0], [0], [1], [0, 0, 1, 1], [], []>} : vector<8x256xf32>, vector<256x512xf32>, vector<8x512xf32> -> vector<8x512xf32>
    %c0_5 = arith.constant 0 : index
    %c0_6 = arith.constant 0 : index
    %20 = vector.load %arg3[%c0_5, %c0_6] : memref<1x512xf32, #tpu.memory_space<vmem>>, vector<1x512xf32>
    %21 = vector.broadcast %20 : vector<1x512xf32> to vector<8x512xf32>
    %22 = arith.addf %19, %21 : vector<8x512xf32>
    %cst_7 = arith.constant 0.000000e+00 : f32
    %23 = vector.broadcast %cst_7 : f32 to vector<8x128xf32>
    %24 = vector.extract_strided_slice %22 {offsets = [0, 0], sizes = [8, 128], strides = [1, 1]} : vector<8x512xf32> to vector<8x128xf32>
    %25 = vector.broadcast %4 : vector<8x1xf32> to vector<8x128xf32>
    %26 = arith.mulf %25, %24 : vector<8x128xf32>
    %27 = arith.addf %23, %26 : vector<8x128xf32>
    %28 = vector.extract_strided_slice %22 {offsets = [0, 128], sizes = [8, 128], strides = [1, 1]} : vector<8x512xf32> to vector<8x128xf32>
    %29 = vector.broadcast %8 : vector<8x1xf32> to vector<8x128xf32>
    %30 = arith.mulf %29, %28 : vector<8x128xf32>
    %31 = arith.addf %27, %30 : vector<8x128xf32>
    %32 = vector.extract_strided_slice %22 {offsets = [0, 256], sizes = [8, 128], strides = [1, 1]} : vector<8x512xf32> to vector<8x128xf32>
    %33 = vector.broadcast %12 : vector<8x1xf32> to vector<8x128xf32>
    %34 = arith.mulf %33, %32 : vector<8x128xf32>
    %35 = arith.addf %31, %34 : vector<8x128xf32>
    %36 = vector.extract_strided_slice %22 {offsets = [0, 384], sizes = [8, 128], strides = [1, 1]} : vector<8x512xf32> to vector<8x128xf32>
    %37 = vector.broadcast %16 : vector<8x1xf32> to vector<8x128xf32>
    %38 = arith.mulf %37, %36 : vector<8x128xf32>
    %39 = arith.addf %35, %38 : vector<8x128xf32>
    %c0_8 = arith.constant 0 : index
    %c0_9 = arith.constant 0 : index
    %40 = vector.load %arg4[%c0_8, %c0_9] : memref<1x128xf32, #tpu.memory_space<vmem>>, vector<1x128xf32>
    %c0_10 = arith.constant 0 : index
    %c0_11 = arith.constant 0 : index
    %41 = vector.load %arg5[%c0_10, %c0_11] : memref<1x128xf32, #tpu.memory_space<vmem>>, vector<1x128xf32>
    %cst_12 = arith.constant dense<0.000000e+00> : vector<8xf32>
    %42 = vector.multi_reduction <add>, %39, %cst_12 [1] : vector<8x128xf32> to vector<8xf32>
    %43 = vector.shape_cast %42 : vector<8xf32> to vector<8x1xf32>
    %44 = arith.mulf %39, %39 : vector<8x128xf32>
    %cst_13 = arith.constant dense<0.000000e+00> : vector<8xf32>
    %45 = vector.multi_reduction <add>, %44, %cst_13 [1] : vector<8x128xf32> to vector<8xf32>
    %46 = vector.shape_cast %45 : vector<8xf32> to vector<8x1xf32>
    %cst_14 = arith.constant 7.812500e-03 : f32
    %47 = vector.broadcast %cst_14 : f32 to vector<8x1xf32>
    %48 = arith.mulf %43, %47 : vector<8x1xf32>
    %cst_15 = arith.constant 7.812500e-03 : f32
    %49 = vector.broadcast %cst_15 : f32 to vector<8x1xf32>
    %50 = arith.mulf %46, %49 : vector<8x1xf32>
    %51 = arith.mulf %48, %48 : vector<8x1xf32>
    %52 = arith.subf %50, %51 : vector<8x1xf32>
    %cst_16 = arith.constant 9.99999974E-6 : f32
    %53 = vector.broadcast %cst_16 : f32 to vector<8x1xf32>
    %54 = arith.addf %52, %53 : vector<8x1xf32>
    %55 = math.rsqrt %54 : vector<8x1xf32>
    %56 = vector.broadcast %48 : vector<8x1xf32> to vector<8x128xf32>
    %57 = arith.subf %39, %56 : vector<8x128xf32>
    %58 = vector.broadcast %55 : vector<8x1xf32> to vector<8x128xf32>
    %59 = arith.mulf %57, %58 : vector<8x128xf32>
    %60 = vector.broadcast %40 : vector<1x128xf32> to vector<8x128xf32>
    %61 = arith.mulf %59, %60 : vector<8x128xf32>
    %62 = vector.broadcast %41 : vector<1x128xf32> to vector<8x128xf32>
    %63 = arith.addf %61, %62 : vector<8x128xf32>
    %c0_17 = arith.constant 0 : index
    %c0_18 = arith.constant 0 : index
    %64 = vector.load %arg6[%c0_17, %c0_18] : memref<128x128xf32, #tpu.memory_space<vmem>>, vector<128x128xf32>
    %cst_19 = arith.constant dense<0.000000e+00> : vector<8x128xf32>
    %65 = tpu.matmul %63, %64, %cst_19 {dimension_numbers = #tpu.dot_dimension_numbers<[1], [0], [0], [1], [0, 0, 1, 1], [], []>} : vector<8x128xf32>, vector<128x128xf32>, vector<8x128xf32> -> vector<8x128xf32>
    %c0_20 = arith.constant 0 : index
    %c0_21 = arith.constant 0 : index
    %66 = vector.load %arg7[%c0_20, %c0_21] : memref<1x128xf32, #tpu.memory_space<vmem>>, vector<1x128xf32>
    %67 = vector.broadcast %66 : vector<1x128xf32> to vector<8x128xf32>
    %68 = arith.addf %65, %67 : vector<8x128xf32>
    %cst_22 = arith.constant 0.000000e+00 : f32
    %69 = vector.broadcast %cst_22 : f32 to vector<8x128xf32>
    %70 = arith.maximumf %68, %69 : vector<8x128xf32>
    %c0_23 = arith.constant 0 : index
    %c0_24 = arith.constant 0 : index
    %71 = vector.load %arg8[%c0_23, %c0_24] : memref<128x128xf32, #tpu.memory_space<vmem>>, vector<128x128xf32>
    %cst_25 = arith.constant dense<0.000000e+00> : vector<8x128xf32>
    %72 = tpu.matmul %70, %71, %cst_25 {dimension_numbers = #tpu.dot_dimension_numbers<[1], [0], [0], [1], [0, 0, 1, 1], [], []>} : vector<8x128xf32>, vector<128x128xf32>, vector<8x128xf32> -> vector<8x128xf32>
    %c0_26 = arith.constant 0 : index
    %c0_27 = arith.constant 0 : index
    %73 = vector.load %arg9[%c0_26, %c0_27] : memref<1x128xf32, #tpu.memory_space<vmem>>, vector<1x128xf32>
    %74 = vector.broadcast %73 : vector<1x128xf32> to vector<8x128xf32>
    %75 = arith.addf %72, %74 : vector<8x128xf32>
    %c0_28 = arith.constant 0 : index
    %c0_29 = arith.constant 0 : index
    %76 = vector.load %arg10[%c0_28, %c0_29] : memref<1x128xf32, #tpu.memory_space<vmem>>, vector<1x128xf32>
    %c0_30 = arith.constant 0 : index
    %c0_31 = arith.constant 0 : index
    %77 = vector.load %arg11[%c0_30, %c0_31] : memref<1x128xf32, #tpu.memory_space<vmem>>, vector<1x128xf32>
    %cst_32 = arith.constant dense<0.000000e+00> : vector<8xf32>
    %78 = vector.multi_reduction <add>, %75, %cst_32 [1] : vector<8x128xf32> to vector<8xf32>
    %79 = vector.shape_cast %78 : vector<8xf32> to vector<8x1xf32>
    %80 = arith.mulf %75, %75 : vector<8x128xf32>
    %cst_33 = arith.constant dense<0.000000e+00> : vector<8xf32>
    %81 = vector.multi_reduction <add>, %80, %cst_33 [1] : vector<8x128xf32> to vector<8xf32>
    %82 = vector.shape_cast %81 : vector<8xf32> to vector<8x1xf32>
    %cst_34 = arith.constant 3.125000e-02 : f32
    %83 = vector.broadcast %cst_34 : f32 to vector<8x1xf32>
    %84 = arith.mulf %79, %83 : vector<8x1xf32>
    %cst_35 = arith.constant 3.125000e-02 : f32
    %85 = vector.broadcast %cst_35 : f32 to vector<8x1xf32>
    %86 = arith.mulf %82, %85 : vector<8x1xf32>
    %87 = arith.mulf %84, %84 : vector<8x1xf32>
    %88 = arith.subf %86, %87 : vector<8x1xf32>
    %cst_36 = arith.constant 9.99999974E-6 : f32
    %89 = vector.broadcast %cst_36 : f32 to vector<8x1xf32>
    %90 = arith.addf %88, %89 : vector<8x1xf32>
    %91 = math.rsqrt %90 : vector<8x1xf32>
    %92 = vector.broadcast %84 : vector<8x1xf32> to vector<8x128xf32>
    %93 = arith.subf %75, %92 : vector<8x128xf32>
    %94 = vector.broadcast %91 : vector<8x1xf32> to vector<8x128xf32>
    %95 = arith.mulf %93, %94 : vector<8x128xf32>
    %96 = vector.broadcast %76 : vector<1x128xf32> to vector<8x128xf32>
    %97 = arith.mulf %95, %96 : vector<8x128xf32>
    %98 = vector.broadcast %77 : vector<1x128xf32> to vector<8x128xf32>
    %99 = arith.addf %97, %98 : vector<8x128xf32>
    %c0_37 = arith.constant 0 : index
    %c0_38 = arith.constant 0 : index
    %100 = vector.load %arg12[%c0_37, %c0_38] : memref<8x128xf32, #tpu.memory_space<vmem>>, vector<8x128xf32>
    tpu.vector_store %arg12[%c0_37, %c0_38], %99 {strides = array<i32>} : memref<8x128xf32, #tpu.memory_space<vmem>>, vector<8x128xf32>,
    return
  }
}

</mosaic_0001>

<bundles_post_ra>
// kernel: encoder_forward.1
= control target key start
LH: loop header
LB: loop body
LE: loop exit
PB: predicated region body
PF: predicated region fallthrough
CT: control target
= control target key end

     0   :  { %17 = vsyncpa [#allocation3], 0  ;;  %s900_s0 = inlined_call_operand.vmem [shape: s32[8,1], index: 0, kind: input, shape index: {}]   ;;  %s901_s1 = inlined_call_operand.hbm [shape: f32[8,256], index: 1, kind: input, shape index: {}]   ;;  %s902_s2 = inlined_call_operand.hbm [shape: f32[256,512], index: 2, kind: input, shape index: {}]   ;;  %s903_s3 = inlined_call_operand.vmem [shape: f32[1,512], index: 3, kind: input, shape index: {}]   ;;  %s904_s4 = inlined_call_operand.vmem [shape: f32[1,128], index: 4, kind: input, shape index: {}]   ;;  %s905_s5 = inlined_call_operand.vmem [shape: f32[1,128], index: 5, kind: input, shape index: {}]   ;;  %s906_s6 = inlined_call_operand.hbm [shape: f32[128,128], index: 6, kind: input, shape index: {}]   ;;  %s907_s7 = inlined_call_operand.vmem [shape: f32[1,128], index: 7, kind: input, shape index: {}]   ;;  %s908_s8 = inlined_call_operand.hbm [shape: f32[128,128], index: 8, kind: input, shape index: {}]   ;;  %s909_s9 = inlined_call_operand.vmem [shape: f32[1,128], index: 9, kind: input, shape index: {}]   ;;  %s910_s10 = inlined_call_operand.vmem [shape: f32[1,128], index: 10, kind: input, shape index: {}]   ;;  %s911_s11 = inlined_call_operand.vmem [shape: f32[1,128], index: 11, kind: input, shape index: {}]   ;;  %s912_s12 = inlined_call_operand.hbm [shape: f32[8,128], index: 12, kind: output, shape index: {}]  }
   0x1   :  { %18 = vsyncpa [#allocation6], 0 }
   0x2   :  { %19 = vsyncpa [#allocation9], 0  ;;  %s38_s23 = sshll.u32 %s902_s2, 4  ;;  %s39_s23 = int_to_ptr.hbm [resolvable:$true] %s38_s23 }
   0x3   :  { %20 = vsyncpa [#allocation4], 0  ;;  %s773_s24 = smov [#allocation5]   ;;  %s28_s28 = sshll.u32 %s901_s1, 4  ;;  %s29_s28 = int_to_ptr.hbm [resolvable:$true] %s28_s28 }
   0x4   :  { %s40_s25 = sshll.u32 %s773_s24, 4  ;;  %s774_s29 = smov 512   ;;  %s41_s25 = int_to_ptr.vmem [resolvable:$true] %s40_s25 }
   0x5   :  { %s775_s30 = smov 32   ;;  %s776_s13 = smov [#allocation2]  }
   0x6   :  { %46 = dma.hbm_to_vmem [thread:$0]  %s39_s23, 16384, %s41_s25, [#allocation6], %s774_s29, %s774_s29, %s775_s30  }
   0x7   :  { %s30_s14 = sshll.u32 %s776_s13, 4  ;;  %s57_s17 = sshll.u32 %s906_s6, 4  ;;  %s31_s14 = int_to_ptr.vmem [resolvable:$true] %s30_s14  ;;  %s58_s17 = int_to_ptr.hbm [resolvable:$true] %s57_s17 }
   0x8   :  { %33 = dma.hbm_to_vmem [thread:$0]  %s29_s28, 256, %s31_s14, [#allocation3]  }
   0x9   :  { %s777_s2 = smov [#allocation7]   ;;  %s72_s1 = sshll.u32 %s908_s8, 4  ;;  %s73_s1 = int_to_ptr.hbm [resolvable:$true] %s72_s1 }
   0xa   :  { %s59_s18 = sshll.u32 %s777_s2, 4  ;;  %s778_s21 = smov 128   ;;  %s60_s18 = int_to_ptr.vmem [resolvable:$true] %s59_s18 }
   0xb   :  { %s779_s22 = smov 8   ;;  %s780_s23 = smov [#allocation8]  }
   0xc   :  { %65 = dma.hbm_to_vmem [thread:$0]  %s58_s17, 2048, %s60_s18, [#allocation6], %s778_s21, %s778_s21, %s779_s22  }
   0xd   :  { %s74_s24 = sshll.u32 %s780_s23, 4  ;;  %s75_s24 = int_to_ptr.vmem [resolvable:$true] %s74_s24 }
   0xe   :  { %80 = dma.hbm_to_vmem [thread:$0]  %s73_s1, 2048, %s75_s24, [#allocation9], %s778_s21, %s778_s21, %s779_s22  }
   0xf   :  { %765 = dma.done.wait [#allocation3], 256  }
  0x10   :  { %766 = vsyncadd [#allocation3], 4294967040 }
  0x11   :  { %767 = dma.done.wait [#allocation6], 18432  }
  0x12   :  { %768 = vsyncadd [#allocation6], 4294948864 }
  0x13   :  { %769 = dma.done.wait [#allocation9], 2048  }
  0x14   :  { %770 = vsyncadd [#allocation9], 4294965248  ;;  %v178_v0 = vld [vmem:[#allocation5 + $0x1e0] sm:$0xff]  ;;  %v179_v1 = vld [vmem:[#allocation5 + $0x1e8] sm:$0xff]  ;;  %s783_s15 = smov [#allocation10]   ;;  %s597_s18 = sshll.u32 %s912_s12, 4  ;;  %s598_s18 = int_to_ptr.hbm [resolvable:$true] %s597_s18 }
  0x15   :  { %v174_v2 = vld [vmem:[#allocation5 + $0x1c0] sm:$0xff]  ;;  %256 = vmatpush.msra.mxu0 %v178_v0  ;;  %296 = vmatpush.msra.mxu2 %v179_v1  ;;  %v175_v4 = vld [vmem:[#allocation5 + $0x1c8] sm:$0xff]  ;;  %v180_v62 = vld [vmem:[#allocation5 + $0x1f0] sm:$0xff]  ;;  %s595_s16 = sshll.u32 %s783_s15, 4  ;;  %s596_s16 = int_to_ptr.vmem [resolvable:$true] %s595_s16 }
  0x16   :  { %v242_v3 = vld [vmem:[#allocation5 + $0x3e0] sm:$0xff]  ;;  %v243_v5 = vld [vmem:[#allocation5 + $0x3e8] sm:$0xff]  ;;  %v181_v63 = vld [vmem:[#allocation5 + $0x1f8] sm:$0xff] }
  0x17   :  { %276 = vmatpush.msra.mxu1 %v242_v3  ;;  %316 = vmatpush.msra.mxu3 %v243_v5  ;;  %v170_v6 = vld [vmem:[#allocation5 + $0x1a0] sm:$0xff]  ;;  %v171_v8 = vld [vmem:[#allocation5 + $0x1a8] sm:$0xff]  ;;  %v244_v3 = vld [vmem:[#allocation5 + $0x3f0] sm:$0xff] }
  0x18   :  { %v238_v7 = vld [vmem:[#allocation5 + $0x3c0] sm:$0xff]  ;;  %257 = vmatpush.msra.mxu0 %v174_v2  ;;  %297 = vmatpush.msra.mxu2 %v175_v4  ;;  %v239_v9 = vld [vmem:[#allocation5 + $0x3c8] sm:$0xff]  ;;  %v176_v2 = vld [vmem:[#allocation5 + $0x1d0] sm:$0xff] }
  0x19   :  { %v234_v10 = vld [vmem:[#allocation5 + $0x3a0] sm:$0xff]  ;;  %277 = vmatpush.msra.mxu1 %v238_v7  ;;  %317 = vmatpush.msra.mxu3 %v239_v9  ;;  %v167_v12 = vld [vmem:[#allocation5 + $0x188] sm:$0xff]  ;;  %v177_v4 = vld [vmem:[#allocation5 + $0x1d8] sm:$0xff] }
  0x1a   :  { %v166_v11 = vld [vmem:[#allocation5 + $0x180] sm:$0xff]  ;;  %v235_v13 = vld [vmem:[#allocation5 + $0x3a8] sm:$0xff]  ;;  %258 = vmatpush.msra.mxu0 %v170_v6  ;;  %298 = vmatpush.msra.mxu2 %v171_v8  ;;  %v245_v5 = vld [vmem:[#allocation5 + $0x3f8] sm:$0xff] }
  0x1b   :  { %v230_v14 = vld [vmem:[#allocation5 + $0x380] sm:$0xff]  ;;  %v231_v15 = vld [vmem:[#allocation5 + $0x388] sm:$0xff]  ;;  %278 = vmatpush.msra.mxu1 %v234_v10  ;;  %318 = vmatpush.msra.mxu3 %v235_v13  ;;  %v172_v6 = vld [vmem:[#allocation5 + $0x1b0] sm:$0xff] }
  0x1c   :  { %v162_v16 = vld [vmem:[#allocation5 + $0x160] sm:$0xff]  ;;  %v163_v17 = vld [vmem:[#allocation5 + $0x168] sm:$0xff]  ;;  %259 = vmatpush.msra.mxu0 %v166_v11  ;;  %299 = vmatpush.msra.mxu2 %v167_v12  ;;  %v240_v7 = vld [vmem:[#allocation5 + $0x3d0] sm:$0xff] }
  0x1d   :  { %v226_v18 = vld [vmem:[#allocation5 + $0x360] sm:$0xff]  ;;  %v227_v19 = vld [vmem:[#allocation5 + $0x368] sm:$0xff]  ;;  %279 = vmatpush.msra.mxu1 %v230_v14  ;;  %319 = vmatpush.msra.mxu3 %v231_v15  ;;  %v173_v8 = vld [vmem:[#allocation5 + $0x1b8] sm:$0xff] }
  0x1e   :  { %v158_v20 = vld [vmem:[#allocation5 + $0x140] sm:$0xff]  ;;  %v159_v21 = vld [vmem:[#allocation5 + $0x148] sm:$0xff]  ;;  %260 = vmatpush.msra.mxu0 %v162_v16  ;;  %300 = vmatpush.msra.mxu2 %v163_v17  ;;  %v241_v9 = vld [vmem:[#allocation5 + $0x3d8] sm:$0xff] }
  0x1f   :  { %v222_v22 = vld [vmem:[#allocation5 + $0x340] sm:$0xff]  ;;  %v223_v23 = vld [vmem:[#allocation5 + $0x348] sm:$0xff]  ;;  %280 = vmatpush.msra.mxu1 %v226_v18  ;;  %320 = vmatpush.msra.mxu3 %v227_v19  ;;  %v168_v10 = vld [vmem:[#allocation5 + $0x190] sm:$0xff] }
  0x20   :  { %v154_v24 = vld [vmem:[#allocation5 + $0x120] sm:$0xff]  ;;  %v155_v25 = vld [vmem:[#allocation5 + $0x128] sm:$0xff]  ;;  %261 = vmatpush.msra.mxu0 %v158_v20  ;;  %301 = vmatpush.msra.mxu2 %v159_v21  ;;  %v236_v11 = vld [vmem:[#allocation5 + $0x3b0] sm:$0xff] }
  0x21   :  { %v218_v26 = vld [vmem:[#allocation5 + $0x320] sm:$0xff]  ;;  %v219_v27 = vld [vmem:[#allocation5 + $0x328] sm:$0xff]  ;;  %281 = vmatpush.msra.mxu1 %v222_v22  ;;  %321 = vmatpush.msra.mxu3 %v223_v23  ;;  %v169_v12 = vld [vmem:[#allocation5 + $0x198] sm:$0xff] }
  0x22   :  { %v150_v28 = vld [vmem:[#allocation5 + $0x100] sm:$0xff]  ;;  %v151_v29 = vld [vmem:[#allocation5 + $0x108] sm:$0xff]  ;;  %262 = vmatpush.msra.mxu0 %v154_v24  ;;  %302 = vmatpush.msra.mxu2 %v155_v25  ;;  %v237_v13 = vld [vmem:[#allocation5 + $0x3b8] sm:$0xff] }
  0x23   :  { %v214_v30 = vld [vmem:[#allocation5 + $0x300] sm:$0xff]  ;;  %v215_v31 = vld [vmem:[#allocation5 + $0x308] sm:$0xff]  ;;  %282 = vmatpush.msra.mxu1 %v218_v26  ;;  %322 = vmatpush.msra.mxu3 %v219_v27  ;;  %v164_v14 = vld [vmem:[#allocation5 + $0x170] sm:$0xff] }
  0x24   :  { %v146_v32 = vld [vmem:[#allocation5 + $0xe0] sm:$0xff]  ;;  %v147_v33 = vld [vmem:[#allocation5 + $0xe8] sm:$0xff]  ;;  %263 = vmatpush.msra.mxu0 %v150_v28  ;;  %303 = vmatpush.msra.mxu2 %v151_v29  ;;  %v232_v15 = vld [vmem:[#allocation5 + $0x390] sm:$0xff] }
  0x25   :  { %v210_v34 = vld [vmem:[#allocation5 + $0x2e0] sm:$0xff]  ;;  %v211_v35 = vld [vmem:[#allocation5 + $0x2e8] sm:$0xff]  ;;  %283 = vmatpush.msra.mxu1 %v214_v30  ;;  %323 = vmatpush.msra.mxu3 %v215_v31  ;;  %v165_v16 = vld [vmem:[#allocation5 + $0x178] sm:$0xff] }
  0x26   :  { %v142_v36 = vld [vmem:[#allocation5 + $0xc0] sm:$0xff]  ;;  %v143_v37 = vld [vmem:[#allocation5 + $0xc8] sm:$0xff]  ;;  %264 = vmatpush.msra.mxu0 %v146_v32  ;;  %304 = vmatpush.msra.mxu2 %v147_v33  ;;  %v233_v17 = vld [vmem:[#allocation5 + $0x398] sm:$0xff] }
  0x27   :  { %v206_v38 = vld [vmem:[#allocation5 + $0x2c0] sm:$0xff]  ;;  %v207_v39 = vld [vmem:[#allocation5 + $0x2c8] sm:$0xff]  ;;  %284 = vmatpush.msra.mxu1 %v210_v34  ;;  %324 = vmatpush.msra.mxu3 %v211_v35  ;;  %v160_v18 = vld [vmem:[#allocation5 + $0x150] sm:$0xff] }
  0x28   :  { %v138_v40 = vld [vmem:[#allocation5 + $0xa0] sm:$0xff]  ;;  %v139_v41 = vld [vmem:[#allocation5 + $0xa8] sm:$0xff]  ;;  %265 = vmatpush.msra.mxu0 %v142_v36  ;;  %305 = vmatpush.msra.mxu2 %v143_v37  ;;  %v228_v19 = vld [vmem:[#allocation5 + $0x370] sm:$0xff] }
  0x29   :  { %v202_v42 = vld [vmem:[#allocation5 + $0x2a0] sm:$0xff]  ;;  %v203_v43 = vld [vmem:[#allocation5 + $0x2a8] sm:$0xff]  ;;  %285 = vmatpush.msra.mxu1 %v206_v38  ;;  %325 = vmatpush.msra.mxu3 %v207_v39  ;;  %v161_v20 = vld [vmem:[#allocation5 + $0x158] sm:$0xff] }
  0x2a   :  { %v134_v44 = vld [vmem:[#allocation5 + $0x80] sm:$0xff]  ;;  %v135_v45 = vld [vmem:[#allocation5 + $0x88] sm:$0xff]  ;;  %266 = vmatpush.msra.mxu0 %v138_v40  ;;  %306 = vmatpush.msra.mxu2 %v139_v41  ;;  %v229_v21 = vld [vmem:[#allocation5 + $0x378] sm:$0xff] }
  0x2b   :  { %v198_v46 = vld [vmem:[#allocation5 + $0x280] sm:$0xff]  ;;  %v199_v47 = vld [vmem:[#allocation5 + $0x288] sm:$0xff]  ;;  %286 = vmatpush.msra.mxu1 %v202_v42  ;;  %326 = vmatpush.msra.mxu3 %v203_v43  ;;  %v156_v22 = vld [vmem:[#allocation5 + $0x130] sm:$0xff] }
  0x2c   :  { %v130_v48 = vld [vmem:[#allocation5 + $0x60] sm:$0xff]  ;;  %v131_v49 = vld [vmem:[#allocation5 + $0x68] sm:$0xff]  ;;  %267 = vmatpush.msra.mxu0 %v134_v44  ;;  %307 = vmatpush.msra.mxu2 %v135_v45  ;;  %v224_v23 = vld [vmem:[#allocation5 + $0x350] sm:$0xff] }
  0x2d   :  { %v194_v50 = vld [vmem:[#allocation5 + $0x260] sm:$0xff]  ;;  %v195_v51 = vld [vmem:[#allocation5 + $0x268] sm:$0xff]  ;;  %287 = vmatpush.msra.mxu1 %v198_v46  ;;  %327 = vmatpush.msra.mxu3 %v199_v47  ;;  %v157_v24 = vld [vmem:[#allocation5 + $0x138] sm:$0xff] }
  0x2e   :  { %v126_v52 = vld [vmem:[#allocation5 + $0x40] sm:$0xff]  ;;  %v127_v53 = vld [vmem:[#allocation5 + $0x48] sm:$0xff]  ;;  %268 = vmatpush.msra.mxu0 %v130_v48  ;;  %308 = vmatpush.msra.mxu2 %v131_v49  ;;  %v225_v25 = vld [vmem:[#allocation5 + $0x358] sm:$0xff] }
  0x2f   :  { %v190_v54 = vld [vmem:[#allocation5 + $0x240] sm:$0xff]  ;;  %v191_v55 = vld [vmem:[#allocation5 + $0x248] sm:$0xff]  ;;  %288 = vmatpush.msra.mxu1 %v194_v50  ;;  %328 = vmatpush.msra.mxu3 %v195_v51  ;;  %v152_v26 = vld [vmem:[#allocation5 + $0x110] sm:$0xff] }
  0x30   :  { %v122_v56 = vld [vmem:[#allocation5 + $0x20] sm:$0xff]  ;;  %v123_v57 = vld [vmem:[#allocation5 + $0x28] sm:$0xff]  ;;  %269 = vmatpush.msra.mxu0 %v126_v52  ;;  %309 = vmatpush.msra.mxu2 %v127_v53  ;;  %v220_v27 = vld [vmem:[#allocation5 + $0x330] sm:$0xff] }
  0x31   :  { %v186_v58 = vld [vmem:[#allocation5 + $0x220] sm:$0xff]  ;;  %v187_v59 = vld [vmem:[#allocation5 + $0x228] sm:$0xff]  ;;  %289 = vmatpush.msra.mxu1 %v190_v54  ;;  %329 = vmatpush.msra.mxu3 %v191_v55  ;;  %v153_v28 = vld [vmem:[#allocation5 + $0x118] sm:$0xff] }
  0x32   :  { %v118_v60 = vld [vmem:[#allocation5] sm:$0xff]  ;;  %v119_v61 = vld [vmem:[#allocation5 + $0x8] sm:$0xff]  ;;  %270 = vmatpush.msra.mxu0 %v122_v56  ;;  %310 = vmatpush.msra.mxu2 %v123_v57  ;;  %v221_v29 = vld [vmem:[#allocation5 + $0x338] sm:$0xff] }
  0x33   :  { %290 = vmatpush.msra.mxu1 %v186_v58  ;;  %330 = vmatpush.msra.mxu3 %v187_v59  ;;  %v182_v0 = vld [vmem:[#allocation5 + $0x200] sm:$0xff]  ;;  %v183_v1 = vld [vmem:[#allocation5 + $0x208] sm:$0xff]  ;;  %v148_v30 = vld [vmem:[#allocation5 + $0xf0] sm:$0xff] }
  0x34   :  { %271 = vmatpush.msra.mxu0 %v118_v60  ;;  %311 = vmatpush.msra.mxu2 %v119_v61  ;;  %v216_v31 = vld [vmem:[#allocation5 + $0x310] sm:$0xff]  ;;  %v149_v32 = vld [vmem:[#allocation5 + $0xf8] sm:$0xff] }
  0x35   :  { %291 = vmatpush.msra.mxu1 %v182_v0  ;;  %331 = vmatpush.msra.mxu3 %v183_v1  ;;  %v217_v33 = vld [vmem:[#allocation5 + $0x318] sm:$0xff]  ;;  %v144_v34 = vld [vmem:[#allocation5 + $0xd0] sm:$0xff] }
  0x36   :  { %336 = vmatpush.msrb.mxu0 %v180_v62  ;;  %376 = vmatpush.msrb.mxu2 %v181_v63  ;;  %v212_v35 = vld [vmem:[#allocation5 + $0x2f0] sm:$0xff]  ;;  %v145_v36 = vld [vmem:[#allocation5 + $0xd8] sm:$0xff]  ;;  %v781_v63 = vmov 0.0  }
  0x37   :  { %356 = vmatpush.msrb.mxu1 %v244_v3  ;;  %396 = vmatpush.msrb.mxu3 %v245_v5  ;;  %v213_v37 = vld [vmem:[#allocation5 + $0x2f8] sm:$0xff]  ;;  %v140_v38 = vld [vmem:[#allocation5 + $0xb0] sm:$0xff] }
  0x38   :  { %337 = vmatpush.msrb.mxu0 %v176_v2  ;;  %377 = vmatpush.msrb.mxu2 %v177_v4  ;;  %v208_v39 = vld [vmem:[#allocation5 + $0x2d0] sm:$0xff]  ;;  %v141_v40 = vld [vmem:[#allocation5 + $0xb8] sm:$0xff] }
  0x39   :  { %357 = vmatpush.msrb.mxu1 %v240_v7  ;;  %397 = vmatpush.msrb.mxu3 %v241_v9  ;;  %v209_v41 = vld [vmem:[#allocation5 + $0x2d8] sm:$0xff]  ;;  %v861_v42 = vld [vmem:[#allocation2] sm:$0xff]  ;;  %v782_v7 = vmov 0  }
  0x3a   :  { %338 = vmatpush.msrb.mxu0 %v172_v6  ;;  %378 = vmatpush.msrb.mxu2 %v173_v8  ;;  %v136_v43 = vld [vmem:[#allocation5 + $0x90] sm:$0xff]  ;;  %v137_v45 = vld [vmem:[#allocation5 + $0x98] sm:$0xff] }
  0x3b   :  { %358 = vmatpush.msrb.mxu1 %v236_v11  ;;  %398 = vmatpush.msrb.mxu3 %v237_v13  ;;  %v204_v44 = vld [vmem:[#allocation5 + $0x2b0] sm:$0xff]  ;;  %v205_v46 = vld [vmem:[#allocation5 + $0x2b8] sm:$0xff] }
  0x3c   :  { %339 = vmatpush.msrb.mxu0 %v168_v10  ;;  %379 = vmatpush.msrb.mxu2 %v169_v12  ;;  %v117_v47 = vld [vmem:[#allocation2 + $0x8] sm:$0xff]  ;;  %v132_v48 = vld [vmem:[#allocation5 + $0x70] sm:$0xff] }
  0x3d   :  { %359 = vmatpush.msrb.mxu1 %v232_v15  ;;  %399 = vmatpush.msrb.mxu3 %v233_v17  ;;  %v200_v49 = vld [vmem:[#allocation5 + $0x290] sm:$0xff]  ;;  %v133_v50 = vld [vmem:[#allocation5 + $0x78] sm:$0xff] }
  0x3e   :  { %340 = vmatpush.msrb.mxu0 %v164_v14  ;;  %380 = vmatpush.msrb.mxu2 %v165_v16  ;;  %v103_v51 = vld [vmem:[%s900_s0] sm:$0xff]  ;;  %v201_v52 = vld [vmem:[#allocation5 + $0x298] sm:$0xff] }
  0x3f   :  { %360 = vmatpush.msrb.mxu1 %v228_v19  ;;  %400 = vmatpush.msrb.mxu3 %v229_v21  ;;  %v128_v53 = vld [vmem:[#allocation5 + $0x50] sm:$0xff]  ;;  %v129_v55 = vld [vmem:[#allocation5 + $0x58] sm:$0xff]  ;;  %vm104_vm0 = vcmp.eq.s32.totalorder %v103_v51, 1  ;;  %vm107_vm1 = vcmp.eq.s32.totalorder %v103_v51, 2  ;;  %vm110_vm2 = vcmp.eq.s32.totalorder %v103_v51, 3  ;;  %vm113_vm3 = vcmp.eq.s32.totalorder %v103_v51, 4 }
  0x40   :  { %341 = vmatpush.msrb.mxu0 %v160_v18  ;;  %381 = vmatpush.msrb.mxu2 %v161_v20  ;;  %v196_v54 = vld [vmem:[#allocation5 + $0x270] sm:$0xff]  ;;  %v197_v56 = vld [vmem:[#allocation5 + $0x278] sm:$0xff]  ;;  %v609_v0 = vsel %vm104_vm0, 1.0, %v781_v63  ;;  %v610_v1 = vsel %vm107_vm1, 1.0, %v781_v63  ;;  %v611_v8 = vsel %vm110_vm2, 1.0, %v781_v63  ;;  %v612_v9 = vsel %vm113_vm3, 1.0, %v781_v63 }
  0x41   :  { %361 = vmatpush.msrb.mxu1 %v224_v23  ;;  %401 = vmatpush.msrb.mxu3 %v225_v25  ;;  %v124_v57 = vld [vmem:[#allocation5 + $0x30] sm:$0xff]  ;;  %v125_v59 = vld [vmem:[#allocation5 + $0x38] sm:$0xff]  ;;  %v625_v5 = vpack.i.bf16 %v610_v1, %v609_v0  ;;  %v630_v10 = vpack.i.bf16 %v612_v9, %v611_v8 }
  0x42   :  { %342 = vmatpush.msrb.mxu0 %v156_v22  ;;  %382 = vmatpush.msrb.mxu2 %v157_v24  ;;  %v192_v58 = vld [vmem:[#allocation5 + $0x250] sm:$0xff]  ;;  %v193_v60 = vld [vmem:[#allocation5 + $0x258] sm:$0xff] }
  0x43   :  { %362 = vmatpush.msrb.mxu1 %v220_v27  ;;  %402 = vmatpush.msrb.mxu3 %v221_v29  ;;  %v120_v61 = vld [vmem:[#allocation5 + $0x10] sm:$0xff]  ;;  %v121_v2 = vld [vmem:[#allocation5 + $0x18] sm:$0xff] }
  0x44   :  { %343 = vmatpush.msrb.mxu0 %v152_v26  ;;  %383 = vmatpush.msrb.mxu2 %v153_v28  ;;  %v188_v62 = vld [vmem:[#allocation5 + $0x230] sm:$0xff]  ;;  %v189_v3 = vld [vmem:[#allocation5 + $0x238] sm:$0xff] }
  0x45   :  { %363 = vmatpush.msrb.mxu1 %v216_v31  ;;  %403 = vmatpush.msrb.mxu3 %v217_v33  ;;  %v184_v4 = vld [vmem:[#allocation5 + $0x210] sm:$0xff]  ;;  %v185_v6 = vld [vmem:[#allocation5 + $0x218] sm:$0xff] }
  0x46   :  { %344 = vmatpush.msrb.mxu0 %v148_v30  ;;  %384 = vmatpush.msrb.mxu2 %v149_v32  ;;  %v246_v12 = vld [vmem:[%s903_s3] sm:$0xf]  ;;  %v532_v0 = vld [vmem:[#allocation8 + $0x78] sm:$0xff] }
  0x47   :  { %364 = vmatpush.msrb.mxu1 %v212_v35  ;;  %404 = vmatpush.msrb.mxu3 %v213_v37  ;;  %v248_v15 = vperm.slane %v246_v12, 0  ;;  %v249_v16 = vperm.slane %v246_v12, 1  ;;  %v250_v18 = vperm.slane %v246_v12, 2  ;;  %v251_v31 = vperm.slane %v246_v12, 3  ;;  %v486_v51 = vld [vmem:[#allocation7 + $0x50] sm:$0xff]  ;;  %v528_v9 = vld [vmem:[#allocation8 + $0x58] sm:$0xff] }
  0x48   :  { %345 = vmatpush.msrb.mxu0 %v144_v34  ;;  %385 = vmatpush.msrb.mxu2 %v145_v36  ;;  %v531_v1 = vld [vmem:[#allocation8 + $0x70] sm:$0xff]  ;;  %v525_v12 = vld [vmem:[#allocation8 + $0x40] sm:$0xff] }
  0x49   :  { %365 = vmatpush.msrb.mxu1 %v208_v39  ;;  %405 = vmatpush.msrb.mxu3 %v209_v41 }
  0x4a   :  { %346 = vmatpush.msrb.mxu0 %v140_v38  ;;  %386 = vmatpush.msrb.mxu2 %v141_v40 }
  0x4b   :  { %312 = vmatmul.f32.vlgmr.msra.gmra.mxu2 %v861_v42  ;;  %366 = vmatpush.msrb.mxu1 %v204_v44 }
  0x4c   :  { %347 = vmatpush.msrb.mxu0 %v136_v43  ;;  %387 = vmatpush.msrb.mxu2 %v137_v45 }
  0x4d   :  { %406 = vmatpush.msrb.mxu3 %v205_v46  ;;  %272 = vmatmul.f32.vlgmr.msra.gmra.mxu0 %v861_v42  ;;  %v491_v46 = vld [vmem:[#allocation7 + $0x78] sm:$0xff] }
  0x4e   :  { %332 = vmatmul.f32.vlgmr.msra.gmra.mxu3 %v117_v47  ;;  %348 = vmatpush.msrb.mxu0 %v132_v48  ;;  %v489_v48 = vld [vmem:[#allocation7 + $0x68] sm:$0xff] }
  0x4f   :  { %367 = vmatpush.msrb.mxu1 %v200_v49  ;;  %388 = vmatpush.msrb.mxu2 %v133_v50  ;;  %v488_v49 = vld [vmem:[#allocation7 + $0x60] sm:$0xff]  ;;  %v487_v50 = vld [vmem:[#allocation7 + $0x58] sm:$0xff] }
  0x50   :  { %407 = vmatpush.msrb.mxu3 %v201_v52  ;;  %292 = vmatmul.f32.vlgmr.msra.gmra.mxu1 %v117_v47  ;;  %v485_v52 = vld [vmem:[#allocation7 + $0x48] sm:$0xff] }
  0x51   :  { %349 = vmatpush.msrb.mxu0 %v128_v53  ;;  %368 = vmatpush.msrb.mxu1 %v196_v54  ;;  %v484_v53 = vld [vmem:[#allocation7 + $0x40] sm:$0xff]  ;;  %v483_v54 = vld [vmem:[#allocation7 + $0x38] sm:$0xff] }
  0x52   :  { %389 = vmatpush.msrb.mxu2 %v129_v55  ;;  %408 = vmatpush.msrb.mxu3 %v197_v56  ;;  %v482_v55 = vld [vmem:[#allocation7 + $0x30] sm:$0xff]  ;;  %v481_v56 = vld [vmem:[#allocation7 + $0x28] sm:$0xff] }
  0x53   :  { %350 = vmatpush.msrb.mxu0 %v124_v57  ;;  %369 = vmatpush.msrb.mxu1 %v192_v58  ;;  %v480_v57 = vld [vmem:[#allocation7 + $0x20] sm:$0xff]  ;;  %v479_v58 = vld [vmem:[#allocation7 + $0x18] sm:$0xff] }
  0x54   :  { %390 = vmatpush.msrb.mxu2 %v125_v59  ;;  %409 = vmatpush.msrb.mxu3 %v193_v60  ;;  %v478_v60 = vld [vmem:[#allocation7 + $0x10] sm:$0xff] }
  0x55   :  { %351 = vmatpush.msrb.mxu0 %v120_v61  ;;  %370 = vmatpush.msrb.mxu1 %v188_v62  ;;  %v477_v61 = vld [vmem:[#allocation7 + $0x8] sm:$0xff]  ;;  %v476_v62 = vld [vmem:[#allocation7] sm:$0xff] }
  0x56   :  { %391 = vmatpush.msrb.mxu2 %v121_v2  ;;  %410 = vmatpush.msrb.mxu3 %v189_v3 }
  0x57   :  { %624 = vset.pattern.permute.xlu0 %v782_v7  ;;  %352 = vmatmul.f32.vlgmr.msrb.gmra.mxu0 %v861_v42  ;;  %v529_v7 = vld [vmem:[#allocation8 + $0x60] sm:$0xff] }
  0x58   :  { %392 = vmatmul.f32.vlgmr.msrb.gmra.mxu2 %v861_v42  ;;  %371 = vmatpush.msrb.mxu1 %v184_v4 }
  0x59   :  { %411 = vmatpush.msrb.mxu3 %v185_v6  ;;  %626 = vperm.xlu0 %624, %v625_v5   ;;  %v530_v5 = vld [vmem:[#allocation8 + $0x68] sm:$0xff] }
  0x5a   :  { %372 = vmatmul.f32.vlgmr.msrb.gmra.mxu1 %v117_v47  ;;  %412 = vmatmul.f32.vlgmr.msrb.gmra.mxu3 %v117_v47  ;;  %v490_v47 = vld [vmem:[#allocation7 + $0x70] sm:$0xff] }
  0x5b   :  { %496 = vmatpush.msra.mxu0 %v491_v46  ;;  %537 = vmatpush.msra.mxu1 %v532_v0 }
  0x5d   :  { %497 = vmatpush.msra.mxu0 %v490_v47  ;;  %538 = vmatpush.msra.mxu1 %v531_v1 }
  0x5f   :  { %498 = vmatpush.msra.mxu0 %v489_v48  ;;  %539 = vmatpush.msra.mxu1 %v530_v5 }
  0x61   :  { %631 = vperm.xlu0 %624, %v630_v10   ;;  %499 = vmatpush.msra.mxu0 %v488_v49  ;;  %v527_v10 = vld [vmem:[#allocation8 + $0x50] sm:$0xff] }
  0x62   :  { %540 = vmatpush.msra.mxu1 %v529_v7 }
  0x63   :  { %500 = vmatpush.msra.mxu0 %v487_v50 }
  0x64   :  { %541 = vmatpush.msra.mxu1 %v528_v9 }
  0x65   :  { %501 = vmatpush.msra.mxu0 %v486_v51 }
  0x66   :  { %542 = vmatpush.msra.mxu1 %v527_v10 }
  0x67   :  { %502 = vmatpush.msra.mxu0 %v485_v52 }
  0x69   :  { %503 = vmatpush.msra.mxu0 %v484_v53 }
  0x6b   :  { %504 = vmatpush.msra.mxu0 %v483_v54 }
  0x6d   :  { %505 = vmatpush.msra.mxu0 %v482_v55 }
  0x6f   :  { %506 = vmatpush.msra.mxu0 %v481_v56  ;;  %v639_v56 = vld [vmem:[%s910_s10] ss:$0 sm:$0xff] }
  0x71   :  { %507 = vmatpush.msra.mxu0 %v480_v57 }
  0x73   :  { %508 = vmatpush.msra.mxu0 %v479_v58 }
  0x75   :  { %509 = vmatpush.msra.mxu0 %v478_v60 }
  0x77   :  { %510 = vmatpush.msra.mxu0 %v477_v61 }
  0x79   :  { %511 = vmatpush.msra.mxu0 %v476_v62 }
  0xca   :  { %v273_v11 = vpop.f32.mrf.mxu0 }
  0xcb   :  { %v627_v13 = vpop.permute.xlu0 %626  ;;  %v274_v19 = vadd.f32 %v273_v11, %v248_v15  ;;  %v526_v11 = vld [vmem:[#allocation8 + $0x48] sm:$0xff] }
  0xcc   :  { %v629_v24 = vunpack.i.h.bf16 %v627_v13  ;;  %v628_v25 = vunpack.i.l.bf16 %v627_v13  ;;  %543 = vmatpush.msra.mxu1 %v526_v11 }
  0xcd   :  { %v293_v14 = vpop.f32.mrf.mxu1 }
  0xce   :  { %v313_v17 = vpop.f32.mrf.mxu2  ;;  %v294_v26 = vadd.f32 %v293_v14, %v274_v19  ;;  %v524_v14 = vld [vmem:[#allocation8 + $0x38] sm:$0xff]  ;;  %544 = vmatpush.msra.mxu1 %v525_v12 }
  0xcf   :  { %v314_v20 = vadd.f32 %v313_v17, %v249_v16  ;;  %v523_v16 = vld [vmem:[#allocation8 + $0x30] sm:$0xff] }
  0xd0   :  { %v421_v32 = vmul.f32 %v628_v25, %v294_v26  ;;  %545 = vmatpush.msra.mxu1 %v524_v14  ;;  %v635_v25 = vld [vmem:[%s904_s4] ss:$0 sm:$0xff] }
  0xd1   :  { %v333_v21 = vpop.f32.mrf.mxu3 }
  0xd2   :  { %v334_v27 = vadd.f32 %v333_v21, %v314_v20  ;;  %546 = vmatpush.msra.mxu1 %v523_v16  ;;  %v521_v20 = vld [vmem:[#allocation8 + $0x20] sm:$0xff] }
  0xd3   :  { %v632_v28 = vpop.permute.xlu0 %631 }
  0xd4   :  { %v353_v22 = vpop.f32.mrf.mxu0  ;;  %v428_v33 = vmul.f32 %v629_v24, %v334_v27  ;;  %v633_v34 = vunpack.i.l.bf16 %v632_v28  ;;  %v634_v40 = vunpack.i.h.bf16 %v632_v28  ;;  %v636_v28 = vld [vmem:[%s905_s5] ss:$0 sm:$0xff] }
  0xd5   :  { %v354_v23 = vadd.f32 %v353_v22, %v250_v18  ;;  %v522_v18 = vld [vmem:[#allocation8 + $0x28] sm:$0xff]  ;;  %v520_v22 = vld [vmem:[#allocation8 + $0x18] sm:$0xff] }
  0xd6   :  { %v429_v39 = vadd.f32 %v428_v33, %v421_v32  ;;  %547 = vmatpush.msra.mxu1 %v522_v18  ;;  %v518_v32 = vld [vmem:[#allocation8 + $0x8] sm:$0xff]  ;;  %v517_v33 = vld [vmem:[#allocation8] sm:$0xff] }
  0xd7   :  { %v373_v29 = vpop.f32.mrf.mxu1 }
  0xd8   :  { %v374_v30 = vadd.f32 %v373_v29, %v354_v23  ;;  %548 = vmatpush.msra.mxu1 %v521_v20 }
  0xda   :  { %v435_v36 = vmul.f32 %v633_v34, %v374_v30  ;;  %549 = vmatpush.msra.mxu1 %v520_v22  ;;  %v637_v34 = vld [vmem:[%s907_s7] ss:$0 sm:$0xff] }
  0xdb   :  { %v393_v35 = vpop.f32.mrf.mxu2 }
  0xdc   :  { %v394_v37 = vadd.f32 %v393_v35, %v251_v31  ;;  %v436_v42 = vadd.f32 %v435_v36, %v429_v39  ;;  %v519_v31 = vld [vmem:[#allocation8 + $0x10] sm:$0xff] }
  0xdd   :  { %v413_v38 = vpop.f32.mrf.mxu3  ;;  %550 = vmatpush.msra.mxu1 %v519_v31 }
  0xde   :  { %v414_v41 = vadd.f32 %v413_v38, %v394_v37  ;;  %v638_v38 = vld [vmem:[%s909_s9] ss:$0 sm:$0xff] }
  0xdf   :  { %551 = vmatpush.msra.mxu1 %v518_v32 }
  0xe0   :  { %v442_v43 = vmul.f32 %v634_v40, %v414_v41 }
  0xe1   :  { %552 = vmatpush.msra.mxu1 %v517_v33 }
  0xe2   :  { %v873_v44 = vadd.f32 %v442_v43, %v436_v42 }
  0xe4   :  { %446 = vadd.xlane.f32.xlu1 %v873_v44  ;;  %v448_v45 = vmul.f32 %v873_v44, %v873_v44 }
  0xec   :  { %449 = vadd.xlane.f32.xlu1 %v448_v45 }
 0x157   :  { %v447_v59 = vpop.xlane.xlu1 %446 }
 0x158   :  { %v451_v63 = vmul.f32 0.0078125, %v447_v59  ;;  %v640_v59 = vld [vmem:[%s911_s11] ss:$0 sm:$0xff] }
 0x15a   :  { %v453_v3 = vmul.f32 %v451_v63, %v451_v63  ;;  %v466_v24 = vsub.f32 %v873_v44, %v451_v63 }
 0x15f   :  { %v450_v2 = vpop.xlane.xlu1 %449 }
 0x160   :  { %v452_v4 = vmul.f32 0.0078125, %v450_v2 }
 0x162   :  { %v454_v6 = vsub.f32 %v452_v4, %v453_v3 }
 0x164   :  { %v455_v8 = vadd.f32 1e-05, %v454_v6 }
 0x166   :  { %641 = vrsqrt.f32 %v455_v8  ;;  %vm462_vm5 = vweird.f32 %v455_v8 }
 0x16c   :  { %v642_v13 = vpop.eup %641 }
 0x16d   :  { %v457_v15 = vmul.f32 %v642_v13, %v455_v8  ;;  %vm463_vm4 = vweird.f32 %v642_v13 }
 0x16e   :  { %vm464_vm6 = vmor %vm462_vm5, %vm463_vm4 }
 0x16f   :  { %v458_v17 = vmul.f32 %v642_v13, %v457_v15 }
 0x171   :  { %v459_v19 = vmul.f32 0.5, %v458_v17 }
 0x173   :  { %v460_v21 = vsub.f32 1.5, %v459_v19 }
 0x175   :  { %v461_v23 = vmul.f32 %v642_v13, %v460_v21 }
 0x177   :  { %v465_v26 = vsel %vm464_vm6, %v642_v13, %v461_v23 }
 0x178   :  { %v467_v27 = vmul.f32 %v466_v24, %v465_v26 }
 0x17a   :  { %v471_v29 = vmul.f32 %v635_v25, %v467_v27 }
 0x17c   :  { %v475_v30 = vadd.f32 %v636_v28, %v471_v29 }
 0x17e   :  { %512 = vmatmul.f32.vlgmr.msra.gmra.mxu0 %v475_v30 }
 0x1fb   :  { %v513_v35 = vpop.f32.mrf.mxu0 }
 0x1fc   :  { %v514_v36 = vadd.f32 %v637_v34, %v513_v35 }
 0x1fe   :  { %v516_v37 = vmax.f32 %v514_v36, 0.0 }
 0x200   :  { %553 = vmatmul.f32.vlgmr.msra.gmra.mxu1 %v516_v37 }
 0x27d   :  { %v554_v39 = vpop.f32.mrf.mxu1 }
 0x27e   :  { %v555_v40 = vadd.f32 %v638_v38, %v554_v39 }
 0x280   :  { %559 = vadd.xlane.f32.xlu2 %v555_v40  ;;  %v561_v41 = vmul.f32 %v555_v40, %v555_v40 }
 0x288   :  { %562 = vadd.xlane.f32.xlu2 %v561_v41 }
 0x2f3   :  { %v560_v42 = vpop.xlane.xlu2 %559 }
 0x2f4   :  { %v564_v43 = vmul.f32 0.03125, %v560_v42 }
 0x2f6   :  { %v566_v45 = vmul.f32 %v564_v43, %v564_v43  ;;  %v579_v55 = vsub.f32 %v555_v40, %v564_v43 }
 0x2fb   :  { %v563_v44 = vpop.xlane.xlu2 %562 }
 0x2fc   :  { %v565_v46 = vmul.f32 0.03125, %v563_v44 }
 0x2fe   :  { %v567_v47 = vsub.f32 %v565_v46, %v566_v45 }
 0x300   :  { %v568_v48 = vadd.f32 1e-05, %v567_v47 }
 0x302   :  { %643 = vrsqrt.f32 %v568_v48  ;;  %vm575_vm8 = vweird.f32 %v568_v48 }
 0x308   :  { %v644_v49 = vpop.eup %643 }
 0x309   :  { %v570_v50 = vmul.f32 %v644_v49, %v568_v48  ;;  %vm576_vm7 = vweird.f32 %v644_v49 }
 0x30a   :  { %vm577_vm9 = vmor %vm575_vm8, %vm576_vm7 }
 0x30b   :  { %v571_v51 = vmul.f32 %v644_v49, %v570_v50 }
 0x30d   :  { %v572_v52 = vmul.f32 0.5, %v571_v51 }
 0x30f   :  { %v573_v53 = vsub.f32 1.5, %v572_v52 }
 0x311   :  { %v574_v54 = vmul.f32 %v644_v49, %v573_v53 }
 0x313   :  { %v578_v57 = vsel %vm577_vm9, %v644_v49, %v574_v54 }
 0x314   :  { %v580_v58 = vmul.f32 %v579_v55, %v578_v57 }
 0x316   :  { %v584_v60 = vmul.f32 %v639_v56, %v580_v58 }
 0x318   :  { %v588_v61 = vadd.f32 %v640_v59, %v584_v60 }
 0x31a   :  { %589 = vst [vmem:[#allocation10] sm:$0xff] %v588_v61 }
 0x31b   :  { %600 = dma.vmem_to_hbm [thread:$0]  %s596_s16, 128, %s598_s18, [#allocation4]  }
 0x31c   :  { %771 = dma.done.wait [#allocation4], 128  }
 0x31d   :  { %772 = vsyncadd [#allocation4], 4294967168 }
 0x31e   :  { %605 = vsyncpa [#allocation3], 1 }
 0x31f   :  { %606 = vsyncpa [#allocation6], 1 }
 0x320   :  { %607 = vsyncpa [#allocation9], 1 }
 0x321   :  { %608 = vsyncpa [#allocation4], 1 }

</bundles_post_ra>
